<compile_context>
chip_gen: v5e
topology: v5e:2x2
jax: 0.10.0
libtpu: 0.0.40
codegen_flags: <defaults>
</compile_context>

<pallas_src>
import jax
import jax.numpy as jnp
from jax.experimental import pallas as pl
from jax.experimental.pallas import tpu as pltpu


def dec_adapter_kernel(x_ref, res_ref, wd_ref, bd_ref, wu_ref, bu_ref,
                       out_ref, down_ref, up_ref):
    x = x_ref[...]                                     # [TN, D]
    # --- adapter_down: Linear(D -> d) + swish -------------------------------
    h = jnp.dot(x, wd_ref[...], preferred_element_type=jnp.float32)
    h = h + bd_ref[...]                                # broadcast (1, d)
    # swish = h * sigmoid(h); sigmoid goes to the EUP (free slot), everything
    # is hidden under the HBM DMAs anyway.
    down = h * jax.nn.sigmoid(h)
    down_ref[...] = down.astype(down_ref.dtype)
    # --- adapter_up: Linear(d -> D) -----------------------------------------
    up = jnp.dot(down, wu_ref[...], preferred_element_type=jnp.float32)
    up = up + bu_ref[...]                              # broadcast (1, D)
    up_ref[...] = up.astype(up_ref.dtype)
    # --- residual (residual_before_ln=False, no LN => simple add) -----------
    out_ref[...] = (up + res_ref[...]).astype(out_ref.dtype)


def _round_up(a, m):
    return (a + m - 1) // m * m


def dec_adapter_forward(x, residual, w_down, b_down, w_up, b_up,
                        *, block_tokens=4096):
    """x, residual: [B, S, D]; w_down: [D, d]; w_up: [d, D]; biases 1-D.

    Returns (output, down, up) with shapes [B,S,D], [B,S,d], [B,S,D].
    """
    B, S, D = x.shape
    d = w_down.shape[1]
    N = B * S
    itemsize = jnp.dtype(x.dtype).itemsize

    x2 = x.reshape(N, D)
    r2 = residual.reshape(N, D)
    bd2 = b_down.reshape(1, d)
    bu2 = b_up.reshape(1, D)

    # --- choose token tile --------------------------------------------------
    # VMEM footprint per token row, accounting for lane padding: every stream
    # pads its last dim to a multiple of 128 lanes, so the (TN, d) `down` tile
    # occupies TN * round_up(d,128) elements (16x nominal when d=8).
    D_eff = _round_up(D, 128)
    d_eff = _round_up(d, 128)
    bytes_per_row = (4 * D_eff + d_eff) * itemsize     # x, res, out, up, down
    vmem_budget = 24 * 1024 * 1024                     # double-buffered tile budget
    max_tn_vmem = max(8, (vmem_budget // (2 * bytes_per_row)) // 8 * 8)

    # Requested tile, clamped down to a multiple of 8 (sublane rule).
    tn_req = max(8, (block_tokens // 8) * 8)

    # Keep >= ~4 grid steps when N allows it: preserves megacore sharding
    # across v7x's two TensorCores and DMA/compute double-buffering.
    tn_steps = max(8, _round_up(pl.cdiv(N, 4), 8))

    TN = min(tn_req, max_tn_vmem, tn_steps)
    grid = (pl.cdiv(N, TN),)                           # partial last block OK

    token_spec_D = pl.BlockSpec((TN, D), lambda i: (i, 0))
    token_spec_d = pl.BlockSpec((TN, d), lambda i: (i, 0))

    def const_spec(shape):
        # fetched once, stays VMEM-resident across all grid steps
        return pl.BlockSpec(shape, lambda i: (0, 0))

    # Explicit scoped-VMEM limit: 2x double-buffered streams + weights + slack.
    # Works on v5e (16 MiB default would otherwise block the big tile) and
    # stays well under v7x's 64 MiB physical VMEM.
    vmem_limit = 32 * 1024 * 1024

    # Advisory cost estimate: tell XLA this is memory-bound.
    flops = 2 * 2 * N * D * d + 8 * N * D + 4 * N * d
    bytes_accessed = (4 * N * D + N * d + 2 * D * d + D + d) * itemsize

    out, down, up = pl.pallas_call(
        dec_adapter_kernel,
        out_shape=(
            jax.ShapeDtypeStruct((N, D), x.dtype),     # output
            jax.ShapeDtypeStruct((N, d), x.dtype),     # down
            jax.ShapeDtypeStruct((N, D), x.dtype),     # up
        ),
        grid=grid,
        in_specs=[
            token_spec_D,          # x
            token_spec_D,          # residual
            const_spec((D, d)),    # w_down
            const_spec((1, d)),    # b_down
            const_spec((d, D)),    # w_up
            const_spec((1, D)),    # b_up
        ],
        out_specs=(token_spec_D, token_spec_d, token_spec_D),
        compiler_params=pltpu.CompilerParams(
            dimension_semantics=("parallel",),
            vmem_limit_bytes=vmem_limit,
        ),
        cost_estimate=pl.CostEstimate(
            flops=int(flops),
            transcendentals=int(N * d),
            bytes_accessed=int(bytes_accessed),
        ),
    )(x2, r2, w_down, bd2, w_up, bu2)

    return (out.reshape(B, S, D),
            down.reshape(B, S, d),
            up.reshape(B, S, D))


def _reference(x, residual, w_down, b_down, w_up, b_up):
    B, S, D = x.shape
    d = w_down.shape[1]
    h = x.reshape(-1, D) @ w_down + b_down
    down = h * jax.nn.sigmoid(h)
    up = down @ w_up + b_up
    out = up + residual.reshape(-1, D)
    return (out.reshape(B, S, D), down.reshape(B, S, d), up.reshape(B, S, D))


if __name__ == "__main__":
    # Small shapes consistent with the module: input_size=128 -> down_sample=8
    D = 128
    d = D // 16  # default reduction_factor behaviour (down_sample=None)

    key = jax.random.PRNGKey(0)
    k_x, k_r, k_wd, k_wu, k_x2, k_r2 = jax.random.split(key, 6)

    # init_bert_weights: Linear weights ~ N(0, 0.02), biases zero.
    # PyTorch Linear weight is [out, in]; we store the transpose [in, out].
    w_down = 0.02 * jax.random.normal(k_wd, (D, d), dtype=jnp.float32)
    b_down = jnp.zeros((d,), dtype=jnp.float32)
    w_up = 0.02 * jax.random.normal(k_wu, (d, D), dtype=jnp.float32)
    b_up = jnp.zeros((D,), dtype=jnp.float32)

    # --- primary run: B=2, S=8 (N=16) ----------------------------------------
    B, S = 2, 8
    x = jax.random.normal(k_x, (B, S, D), dtype=jnp.float32)
    residual = jax.random.normal(k_r, (B, S, D), dtype=jnp.float32)

    out, down, up = dec_adapter_forward(x, residual, w_down, b_down, w_up, b_up)
    jax.block_until_ready((out, down, up))

    out_r, down_r, up_r = _reference(x, residual, w_down, b_down, w_up, b_up)
    assert jnp.allclose(out, out_r, atol=1e-5)
    assert jnp.allclose(down, down_r, atol=1e-5)
    assert jnp.allclose(up, up_r, atol=1e-5)

    # --- ragged run: N not a multiple of 8 -> exercises the partial-block path
    B2, S2 = 1, 9
    x2 = jax.random.normal(k_x2, (B2, S2, D), dtype=jnp.float32)
    r2 = jax.random.normal(k_r2, (B2, S2, D), dtype=jnp.float32)
    out2, down2, up2 = dec_adapter_forward(x2, r2, w_down, b_down, w_up, b_up)
    jax.block_until_ready((out2, down2, up2))
    out2_r, down2_r, up2_r = _reference(x2, r2, w_down, b_down, w_up, b_up)
    assert jnp.allclose(out2, out2_r, atol=1e-5)
    assert jnp.allclose(down2, down2_r, atol=1e-5)
    assert jnp.allclose(up2, up2_r, atol=1e-5)

    # --- odd block_tokens request (clamped to multiple of 8) -----------------
    out3, down3, up3 = dec_adapter_forward(x, residual, w_down, b_down, w_up,
                                           b_up, block_tokens=500)
    jax.block_until_ready((out3, down3, up3))
    assert jnp.allclose(out3, out_r, atol=1e-5)

    print("KERNEL_OK")
</pallas_src>

<mosaic_0001>
module attributes {stable_mosaic.version = 11 : i64} {
  func.func @dec_adapter_kernel(%arg0: i32, %arg1: memref<8x128xf32, #tpu.memory_space<vmem>>, %arg2: memref<8x128xf32, #tpu.memory_space<vmem>>, %arg3: memref<128x8xf32, #tpu.memory_space<vmem>>, %arg4: memref<1x8xf32, #tpu.memory_space<vmem>>, %arg5: memref<8x128xf32, #tpu.memory_space<vmem>>, %arg6: memref<1x128xf32, #tpu.memory_space<vmem>>, %arg7: memref<8x128xf32, #tpu.memory_space<vmem>>, %arg8: memref<8x8xf32, #tpu.memory_space<vmem>>, %arg9: memref<8x128xf32, #tpu.memory_space<vmem>>) attributes {dimension_semantics = [#tpu.dimension_semantics<parallel>], iteration_bounds = array<i64: 2>, scalar_prefetch = 0 : i64, scratch_operands = 0 : i64, tpu.core_type = #tpu.core_type<tc>, window_params = [{transform_indices = @transform_0, window_bounds = array<i64: 8, 128>}, {transform_indices = @transform_1, window_bounds = array<i64: 8, 128>}, {pipeline_mode = #tpu.pipeline_mode<synchronous>, transform_indices = @transform_2, window_bounds = array<i64: 128, 8>}, {pipeline_mode = #tpu.pipeline_mode<synchronous>, transform_indices = @transform_3, window_bounds = array<i64: 1, 8>}, {pipeline_mode = #tpu.pipeline_mode<synchronous>, transform_indices = @transform_4, window_bounds = array<i64: 8, 128>}, {pipeline_mode = #tpu.pipeline_mode<synchronous>, transform_indices = @transform_5, window_bounds = array<i64: 1, 128>}, {transform_indices = @transform_6, window_bounds = array<i64: 8, 128>}, {transform_indices = @transform_7, window_bounds = array<i64: 8, 8>}, {transform_indices = @transform_8, window_bounds = array<i64: 8, 128>}]} {
    %c0 = arith.constant 0 : index
    %c0_0 = arith.constant 0 : index
    %0 = vector.load %arg1[%c0, %c0_0] : memref<8x128xf32, #tpu.memory_space<vmem>>, vector<8x128xf32>
    %c0_1 = arith.constant 0 : index
    %c0_2 = arith.constant 0 : index
    %1 = vector.load %arg3[%c0_1, %c0_2] : memref<128x8xf32, #tpu.memory_space<vmem>>, vector<128x8xf32>
    %cst = arith.constant dense<0.000000e+00> : vector<8x8xf32>
    %2 = tpu.matmul %0, %1, %cst {dimension_numbers = #tpu.dot_dimension_numbers<[1], [0], [0], [1], [0, 0, 1, 1], [], []>} : vector<8x128xf32>, vector<128x8xf32>, vector<8x8xf32> -> vector<8x8xf32>
    %c0_3 = arith.constant 0 : index
    %c0_4 = arith.constant 0 : index
    %3 = vector.load %arg4[%c0_3, %c0_4] : memref<1x8xf32, #tpu.memory_space<vmem>>, vector<1x8xf32>
    %4 = vector.broadcast %3 : vector<1x8xf32> to vector<8x8xf32>
    %5 = arith.addf %2, %4 : vector<8x8xf32>
    %6 = arith.negf %5 : vector<8x8xf32>
    %7 = math.exp %6 : vector<8x8xf32>
    %cst_5 = arith.constant 1.000000e+00 : f32
    %8 = vector.broadcast %cst_5 : f32 to vector<8x8xf32>
    %9 = arith.addf %8, %7 : vector<8x8xf32>
    %10 = arith.divf %8, %9 : vector<8x8xf32>
    %11 = arith.mulf %5, %10 : vector<8x8xf32>
    %c0_6 = arith.constant 0 : index
    %c0_7 = arith.constant 0 : index
    %12 = vector.load %arg8[%c0_6, %c0_7] : memref<8x8xf32, #tpu.memory_space<vmem>>, vector<8x8xf32>
    tpu.vector_store %arg8[%c0_6, %c0_7], %11 {strides = array<i32>} : memref<8x8xf32, #tpu.memory_space<vmem>>, vector<8x8xf32>,
    %c0_8 = arith.constant 0 : index
    %c0_9 = arith.constant 0 : index
    %13 = vector.load %arg5[%c0_8, %c0_9] : memref<8x128xf32, #tpu.memory_space<vmem>>, vector<8x128xf32>
    %cst_10 = arith.constant dense<0.000000e+00> : vector<8x128xf32>
    %14 = tpu.matmul %11, %13, %cst_10 {dimension_numbers = #tpu.dot_dimension_numbers<[1], [0], [0], [1], [0, 0, 1, 1], [], []>} : vector<8x8xf32>, vector<8x128xf32>, vector<8x128xf32> -> vector<8x128xf32>
    %c0_11 = arith.constant 0 : index
    %c0_12 = arith.constant 0 : index
    %15 = vector.load %arg6[%c0_11, %c0_12] : memref<1x128xf32, #tpu.memory_space<vmem>>, vector<1x128xf32>
    %16 = vector.broadcast %15 : vector<1x128xf32> to vector<8x128xf32>
    %17 = arith.addf %14, %16 : vector<8x128xf32>
    %c0_13 = arith.constant 0 : index
    %c0_14 = arith.constant 0 : index
    %18 = vector.load %arg9[%c0_13, %c0_14] : memref<8x128xf32, #tpu.memory_space<vmem>>, vector<8x128xf32>
    tpu.vector_store %arg9[%c0_13, %c0_14], %17 {strides = array<i32>} : memref<8x128xf32, #tpu.memory_space<vmem>>, vector<8x128xf32>,
    %c0_15 = arith.constant 0 : index
    %c0_16 = arith.constant 0 : index
    %19 = vector.load %arg2[%c0_15, %c0_16] : memref<8x128xf32, #tpu.memory_space<vmem>>, vector<8x128xf32>
    %20 = arith.addf %17, %19 : vector<8x128xf32>
    %c0_17 = arith.constant 0 : index
    %c0_18 = arith.constant 0 : index
    %21 = vector.load %arg7[%c0_17, %c0_18] : memref<8x128xf32, #tpu.memory_space<vmem>>, vector<8x128xf32>
    tpu.vector_store %arg7[%c0_17, %c0_18], %20 {strides = array<i32>} : memref<8x128xf32, #tpu.memory_space<vmem>>, vector<8x128xf32>,
    return
  }
  func.func @transform_0(%arg0: i32) -> (i32, i32) {
    %c0_i32 = arith.constant 0 : i32
    %c0_i32_0 = arith.constant 0 : i32
    return %arg0, %c0_i32 : i32, i32
  }
  func.func @transform_1(%arg0: i32) -> (i32, i32) {
    %c0_i32 = arith.constant 0 : i32
    %c0_i32_0 = arith.constant 0 : i32
    return %arg0, %c0_i32 : i32, i32
  }
  func.func @transform_2(%arg0: i32) -> (i32, i32) {
    %c0_i32 = arith.constant 0 : i32
    %c0_i32_0 = arith.constant 0 : i32
    %c0_i32_1 = arith.constant 0 : i32
    return %c0_i32, %c0_i32_0 : i32, i32
  }
  func.func @transform_3(%arg0: i32) -> (i32, i32) {
    %c0_i32 = arith.constant 0 : i32
    %c0_i32_0 = arith.constant 0 : i32
    %c0_i32_1 = arith.constant 0 : i32
    return %c0_i32, %c0_i32_0 : i32, i32
  }
  func.func @transform_4(%arg0: i32) -> (i32, i32) {
    %c0_i32 = arith.constant 0 : i32
    %c0_i32_0 = arith.constant 0 : i32
    %c0_i32_1 = arith.constant 0 : i32
    return %c0_i32, %c0_i32_0 : i32, i32
  }
  func.func @transform_5(%arg0: i32) -> (i32, i32) {
    %c0_i32 = arith.constant 0 : i32
    %c0_i32_0 = arith.constant 0 : i32
    %c0_i32_1 = arith.constant 0 : i32
    return %c0_i32, %c0_i32_0 : i32, i32
  }
  func.func @transform_6(%arg0: i32) -> (i32, i32) {
    %c0_i32 = arith.constant 0 : i32
    %c0_i32_0 = arith.constant 0 : i32
    return %arg0, %c0_i32 : i32, i32
  }
  func.func @transform_7(%arg0: i32) -> (i32, i32) {
    %c0_i32 = arith.constant 0 : i32
    %c0_i32_0 = arith.constant 0 : i32
    return %arg0, %c0_i32 : i32, i32
  }
  func.func @transform_8(%arg0: i32) -> (i32, i32) {
    %c0_i32 = arith.constant 0 : i32
    %c0_i32_0 = arith.constant 0 : i32
    return %arg0, %c0_i32 : i32, i32
  }
}

</mosaic_0001>

<bundles_post_ra>
// kernel: tpu_custom_call.1
= control target key start
LH: loop header
LB: loop body
LE: loop exit
PB: predicated region body
PF: predicated region fallthrough
CT: control target
= control target key end

     0   :  { %s990_s0 = inlined_call_operand.vmem [shape: f32[16,128], index: 0, kind: input, shape index: {}]   ;;  %s991_s1 = inlined_call_operand.vmem [shape: f32[16,128], index: 1, kind: input, shape index: {}]   ;;  %s992_s2 = inlined_call_operand.vmem [shape: f32[128,8], index: 2, kind: input, shape index: {}]   ;;  %s993_s3 = inlined_call_operand.vmem [shape: f32[1,8], index: 3, kind: input, shape index: {}]   ;;  %s994_s4 = inlined_call_operand.vmem [shape: f32[8,128], index: 4, kind: input, shape index: {}]   ;;  %s995_s5 = inlined_call_operand.vmem [shape: f32[1,128], index: 5, kind: input, shape index: {}]   ;;  %s996_s6 = inlined_call_operand.hbm [shape: f32[16,128], index: 6, kind: output, shape index: {0}]   ;;  %s997_s7 = inlined_call_operand.vmem [shape: f32[16,8], index: 7, kind: output, shape index: {1}]   ;;  %s998_s8 = inlined_call_operand.hbm [shape: f32[16,128], index: 8, kind: output, shape index: {2}]  }
   0x1   :  { %999 = sst [smem:[#allocation9_spill]] %s990_s0 }
   0x2   :  { %1000 = sst [smem:[#allocation10_spill]] %s992_s2 }
   0x3   :  { %1001 = sst [smem:[#allocation11_spill]] %s993_s3 }
   0x4   :  { %1002 = sst [smem:[#allocation12_spill]] %s994_s4 }
   0x5   :  { %1003 = sst [smem:[#allocation13_spill]] %s997_s7 }
   0x6   :  { %14 = vsyncpa [#allocation3], 0 }
   0x7   :  { %16 = vsyncpa [#allocation3 + $0x1], 0 }
   0x8   :  { %17 = vsyncpa [#allocation5], 0 }
   0x9   :  { %19 = vsyncpa [#allocation5 + $0x1], 0  ;;  %s812_s27 = smov 0   ;;  %s814_s28 = smov 0  }
   0xa   :  { %s816_s29 = smov 0   ;;  %s818_s30 = smov 0  }
   0xb LB: > { %s833_s9 = sadd.s32 4294967295, %s765_s30   ;;  %s604_s10 = sadd.s32 4294967294, %s765_s30   ;;  %s765_s30 = sphi %s818_s30, %s1016_s30   ;;  %s761_s29 = sphi %s816_s29, %s1015_s29   ;;  %s757_s28 = sphi %s814_s28, %s1014_s28   ;;  %s753_s27 = sphi %s812_s27, %s1013_s27  }
   0xc   : > { %s837_s11 = sadd.s32 1, %s765_s30   ;;  %s168_s12 = sadd.s32 1, %s761_s29 }
   0xd   : > { %s165_s13 = ssub.s32 %s765_s30, %s837_s11  ;;  %p178_p0 = scmp.ne.s32.totalorder %s761_s29, %s757_s28 }
   0xe   : > { %p166_p1 = scmp.eq.s32.totalorder %s165_s13, 0  ;;  %p179_p2 = scmp.eq.s32.totalorder %s833_s9, 1 }
   0xf   : > { %p184_p3 = scmp.ne.s32.totalorder %s757_s28, %s753_s27  ;;  %p185_p4 = scmp.eq.s32.totalorder %s604_s10, 1 }
  0x10   : > { %s848_s14 = scalar_select %p166_p1, %s761_s29, %s168_s12  }
  0x11   : > { %p850_p5 = por %p179_p2, %p178_p0  ;;  %p854_p6 = por %p185_p4, %p184_p3 }
  0x12   : > { %1004 = sst [smem:[#allocation8_spill]] %s848_s14  ;;  %p607_p7 = scmp.ge.s32.totalorder %s765_s30, 1 }
  0x13   : > { %p281_p8 = scmp.lt.s32.totalorder %s765_s30, 3 }
  0x15   : > { %p282_p9 = pnand %p607_p7, %p281_p8 }
  0x16   : > { %s1007_s2 = sld [smem:[#allocation10_spill]] (!%p282_p9)  ;;  %p327_p10 = scmp.lt.s32.totalorder (!%p282_p9), %s833_s9, 1 }
  0x17   : > { %285 = sbr.rel (%p282_p9) target bundleno = 361 (0x169), region = 44  ;;  %s1008_s0 = sld [smem:[#allocation9_spill]] (!%p282_p9) }
  0x18   : > { %s1009_s3 = sld [smem:[#allocation11_spill]] (!%p282_p9)  ;;  %s927_s23 = sand.u32 (!%p282_p9), 1, %s757_s28  }
  0x19   : > { %s1010_s4 = sld [smem:[#allocation12_spill]] (!%p282_p9)  ;;  %s608_s24 = sshll.u32 (!%p282_p9), %s927_s23, 3 }
  0x1a   : > { %s1011_s7 = sld [smem:[#allocation13_spill]] (!%p282_p9) }
  0x1c   : > { %v355_v0 = vld [vmem:[%s1007_s2 + $0x78] sm:$0xff]  ;;  %v354_v1 = vld [vmem:[%s1007_s2 + $0x70] sm:$0xff]  ;;  %v353_v2 = vld [vmem:[%s1007_s2 + $0x68] sm:$0xff]  ;;  %s328_s26 = scalar_select %p327_p10, %s833_s9, 1  ;;  %vm400_vm4 = vcmask 64512  }
  0x1d   : > { %360 = vmatpush.msra.mxu0 %v355_v0  ;;  %v352_v3 = vld [vmem:[%s1007_s2 + $0x60] sm:$0xff]  ;;  %v351_v4 = vld [vmem:[%s1007_s2 + $0x58] sm:$0xff]  ;;  %v350_v5 = vld [vmem:[%s1007_s2 + $0x50] sm:$0xff] }
  0x1e   : > { %v349_v6 = vld [vmem:[%s1007_s2 + $0x48] sm:$0xff]  ;;  %v348_v7 = vld [vmem:[%s1007_s2 + $0x40] sm:$0xff]  ;;  %v347_v8 = vld [vmem:[%s1007_s2 + $0x38] sm:$0xff]  ;;  %s901_s18 = sshll.u32 %s328_s26, 3 }
  0x1f   : > { %361 = vmatpush.msra.mxu0 %v354_v1  ;;  %v346_v9 = vld [vmem:[%s1007_s2 + $0x30] sm:$0xff]  ;;  %v345_v10 = vld [vmem:[%s1007_s2 + $0x28] sm:$0xff]  ;;  %v344_v11 = vld [vmem:[%s1007_s2 + $0x20] sm:$0xff]  ;;  %s330_s25 = scalar_lea.vmem %s1008_s0, %s901_s18  ;;  %s334_s19 = scalar_lea.vmem %s991_s1, %s901_s18 }
  0x20   : > { %v343_v12 = vld [vmem:[%s1007_s2 + $0x18] sm:$0xff]  ;;  %v342_v13 = vld [vmem:[%s1007_s2 + $0x10] sm:$0xff]  ;;  %v341_v14 = vld [vmem:[%s1007_s2 + $0x8] sm:$0xff]  ;;  %s338_s22 = scalar_lea.vmem %s1011_s7, %s901_s18  ;;  %s313_s7 = scalar_lea.vmem [#allocation2], %s608_s24 }
  0x21   : > { %362 = vmatpush.msra.mxu0 %v353_v2  ;;  %v340_v15 = vld [vmem:[%s1007_s2] sm:$0xff]  ;;  %s456_s14 = sshll.u32 %s313_s7, 4  ;;  %s444_s0 = scalar_lea.sflag [#allocation5], %s927_s23  ;;  %s944_s14 = int_to_ptr.vmem [resolvable:$true] %s456_s14 }
  0x22   : > { %v339_v16 = vld [vmem:[%s330_s25] sm:$0xff]  ;;  %s617_s25 = sshll.u32 %s833_s9, 3 }
  0x23   : > { %363 = vmatpush.msra.mxu0 %v352_v3  ;;  %v665_v17 = vld [vmem:[%s1009_s3] ss:$0 sm:$0xff]  ;;  %s471_s26 = scalar_lea.hbm %s998_s8, %s617_s25  ;;  %s454_s2 = scalar_lea.hbm %s996_s6, %s617_s25 }
  0x24   : > { %v402_v18 = vld [vmem:[%s1010_s4] sm:$0xff]  ;;  %s326_s3 = scalar_lea.vmem [#allocation4], %s608_s24  ;;  %s475_s9 = sshll.u32 %s471_s26, 4  ;;  %s476_s9 = int_to_ptr.hbm [resolvable:$true] %s475_s9 }
  0x25   : > { %364 = vmatpush.msra.mxu0 %v351_v4  ;;  %425 = vmatpush.msra.mxu1 %v402_v18  ;;  %v666_v35 = vld [vmem:[%s995_s5] ss:$0 sm:$0xff]  ;;  %s473_s4 = sshll.u32 %s326_s3, 4  ;;  %s458_s10 = sshll.u32 %s454_s2, 4  ;;  %s474_s4 = int_to_ptr.vmem [resolvable:$true] %s473_s4  ;;  %s946_s10 = int_to_ptr.hbm [resolvable:$true] %s458_s10 }
  0x26   : > { %v431_v37 = vld [vmem:[%s334_s19] sm:$0xff]  ;;  %s685_s18 = sshra.s32 %s476_s9, 4  ;;  %s691_s2 = scalar_lea.hbm %s998_s8, 16  ;;  %s686_s18 = int_to_ptr.hbm [resolvable:$true] %s685_s18 }
  0x27   : > { %365 = vmatpush.msra.mxu0 %v350_v5  ;;  %s687_s25 = scalar_lea.hbm %s686_s18, 8  ;;  %p692_p0 = scmp.lt.s32.totalorder %s686_s18, %s998_s8 }
  0x28   : > { %p688_p11 = scmp.ne.s32.totalorder %s686_s18, %s687_s25  ;;  %p693_p1 = scmp.lt.s32.totalorder %s691_s2, %s687_s25 }
  0x29   : > { %366 = vmatpush.msra.mxu0 %v349_v6 }
  0x2a   : > { %p689_p12 = pnand %p688_p11, %p850_p5  ;;  %p694_p2 = por %p693_p1, %p692_p0 }
  0x2b   : > { %367 = vmatpush.msra.mxu0 %v348_v7 }
  0x2c   : > { %p690_p13 = pneg %p689_p12 }
  0x2d   : > { %368 = vmatpush.msra.mxu0 %v347_v8 }
  0x2e   : > { %p695_p3 = pnand %p694_p2, %p690_p13 }
  0x2f   : > { %369 = vmatpush.msra.mxu0 %v346_v9 }
  0x31   : > { %370 = vmatpush.msra.mxu0 %v345_v10 }
  0x33   : > { %371 = vmatpush.msra.mxu0 %v344_v11 }
  0x35   : > { %372 = vmatpush.msra.mxu0 %v343_v12 }
  0x37   : > { %373 = vmatpush.msra.mxu0 %v342_v13 }
  0x39   : > { %374 = vmatpush.msra.mxu0 %v341_v14 }
  0x3b   : > { %375 = vmatpush.msra.mxu0 %v340_v15 }
  0x3c   : > { %376 = vmatmul.f32.vlgmr.msra.gmra.mxu0 %v339_v16 }
  0xb9   : > { %v377_v19 = vpop.f32.mrf.mxu0 }
  0xba   : > { %v378_v20 = vadd.f32 %v665_v17, %v377_v19 }
  0xbc   : > { %v613_v21 = vmul.f32 -1.442695, %v378_v20 }
  0xbe   : > { %667 = vpow2.f32 %v613_v21 }
  0xc4   : > { %v668_v22 = vpop.eup %667 }
  0xc5   : > { %v383_v23 = vadd.f32 1.0, %v668_v22 }
  0xc7   : > { %669 = vrcp.f32 %v383_v23  ;;  %v395_v27 = vand.u32 2147483648, %v383_v23  ;;  %v393_v29 = vand.u32 2147483647, %v383_v23  ;;  %vm389_vm1 = vweird.f32 %v383_v23 }
  0xc9   : > { %v396_v31 = vor.u32 1.1754944e-38, %v395_v27  ;;  %vm394_vm3 = vcmp.eq.f32.partialorder %v393_v29, 8.507059e+37 }
  0xcd   : > { %v670_v24 = vpop.eup %669 }
  0xce   : > { %v385_v25 = vmul.f32 %v670_v24, %v383_v23  ;;  %vm390_vm0 = vweird.f32 %v670_v24 }
  0xcf   : > { %vm391_vm2 = vmor %vm389_vm1, %vm390_vm0 }
  0xd0   : > { %v386_v26 = vsub.f32 1.0, %v385_v25 }
  0xd2   : > { %v387_v28 = vmul.f32 %v670_v24, %v386_v26 }
  0xd4   : > { %v388_v30 = vadd.f32 %v670_v24, %v387_v28 }
  0xd6   : > { %v392_v32 = vsel %vm391_vm2, %v670_v24, %v388_v30 }
  0xd7   : > { %v397_v33 = vsel %vm394_vm3, %v396_v31, %v392_v32 }
  0xd8   : > { %v399_v34 = vmul.f32 %v397_v33, %v378_v20 }
  0xda   : > { %401 = vst.msk [vmem:[%s338_s22] sm:$0xff] %vm400_vm4, %v399_v34  ;;  %614 = vmatmul.msk.f32.vlgmr.msra.gmra.mxu1 %vm400_vm4, %v399_v34 }
 0x157   : > { %v427_v36 = vpop.f32.mrf.mxu1 }
 0x158   : > { %v428_v38 = vadd.f32 %v666_v35, %v427_v36 }
 0x15a   : > { %430 = vst [vmem:[%s326_s3] sm:$0xff] %v428_v38  ;;  %v432_v39 = vadd.f32 %v431_v37, %v428_v38 }
 0x15b   : > { %698 = shalt.err (!%p695_p3)
}
 0x15c   : > { %622 = dma.vmem_to_hbm [thread:$0]  (%p850_p5), %s474_s4, 128, %s476_s9, %s444_s0   ;;  %433 = vst [vmem:[%s313_s7] sm:$0xff] %v432_v39 }
 0x15d   : > { %s435_s3 = scalar_lea.sflag [#allocation3], %s927_s23  ;;  %s713_s17 = sshra.s32 %s946_s10, 4  ;;  %s714_s17 = int_to_ptr.hbm [resolvable:$true] %s713_s17 }
 0x15e   : > { %s715_s19 = scalar_lea.hbm %s714_s17, 8  ;;  %s719_s22 = scalar_lea.hbm %s996_s6, 16 }
 0x15f   : > { %p716_p4 = scmp.ne.s32.totalorder %s714_s17, %s715_s19  ;;  %p720_p9 = scmp.lt.s32.totalorder %s714_s17, %s996_s6 }
 0x160   : > { %p721_p10 = scmp.lt.s32.totalorder %s719_s22, %s715_s19 }
 0x161   : > { %p717_p7 = pnand %p716_p4, %p850_p5 }
 0x162   : > { %p722_p11 = por %p721_p10, %p720_p9 }
 0x163   : > { %p718_p8 = pneg %p717_p7 }
 0x165   : > { %p723_p12 = pnand %p722_p11, %p718_p8 }
 0x167   : > { %726 = shalt.err (!%p723_p12)
}
 0x168   : > { %621 = dma.vmem_to_hbm [thread:$0]  (%p850_p5), %s944_s14, 128, %s946_s10, %s435_s3  }
 0x169 PF: > { %p632_p13 = scmp.ge.s32.totalorder %s765_s30, 2  ;;  %s487_s4 = sand.u32 1, %s753_s27  }
 0x16a   : > { %s488_s7 = scalar_lea.sflag [#allocation3], %s487_s4 }
 0x16b   : > { %p626_p0 = pnand %p632_p13, %p854_p6 }
 0x16d   : > { %p627_p1 = pneg %p626_p0 }
 0x16f   : > { %744 = dma.done.wait (%p627_p1), %s488_s7, 128  }
 0x170   : > { %746 = vsyncadd (%p627_p1), %s488_s7, 4294967168  ;;  %s505_s23 = scalar_lea.sflag [#allocation5], %s487_s4 }
 0x171   : > { %748 = dma.done.wait (%p627_p1), %s505_s23, 128  }
 0x172   : > { %750 = vsyncadd (%p627_p1), %s505_s23, 4294967168  ;;  %s1012_s15 = sld [smem:[#allocation8_spill]]  ;;  %p22_p5 = scmp.ge.s32.totalorder %s837_s11, 4  }
 0x173   : > { %s1013_s27 = smov %s757_s28  ;;  %s1014_s28 = smov %s761_s29 }
 0x174   : > { %s1016_s30 = smov %s837_s11  ;;  %24 = sbr.rel (!%p22_p5) target bundleno = 11 (0xb), region = 111 }
 0x178   : > { %s1015_s29 = smov %s1012_s15 }
 0x179   :  { %511 = vsyncpa [#allocation3], 1 }
 0x17a   :  { %513 = vsyncpa [#allocation3 + $0x1], 1 }
 0x17b   :  { %514 = vsyncpa [#allocation5], 1 }
 0x17c   :  { %516 = vsyncpa [#allocation5 + $0x1], 1 }

</bundles_post_ra>
